<compile_context>
chip_gen: v6e
topology: v6e:2x2x1
jax: 0.10.0
libtpu: 0.0.40
codegen_flags: <defaults>
</compile_context>

<pallas_src>
import jax
import jax.numpy as jnp
from jax import lax
from jax.experimental import pallas as pl
from jax.experimental.pallas import tpu as pltpu


def _round_up(x, m):
    return ((x + m - 1) // m) * m


def deepfm_forward(Xi, Xv, params, *, block_b=4096, mxu_dtype=jnp.float32):
    """DeepFM forward: gather + FM (1st & 2nd order) + 2-layer ReLU MLP, fused."""
    t1 = params["fm_first_tables"]        # (F, V, 1)
    t2 = params["fm_second_tables"]       # (F, V, E)
    w1, b1 = params["w1"], params["b1"]   # (H1, F*E), (H1, 1)   torch (out,in)
    w2, b2 = params["w2"], params["b2"]   # (H2, H1),  (H2, 1)
    bias = params["bias"]                 # (1, 1)

    B, F, _ = Xi.shape
    V = t1.shape[1]
    E = t2.shape[-1]
    FE = F * E
    H1, H2 = w1.shape[0], w2.shape[0]
    assert H1 % 8 == 0, "deep_layers[0] must be a multiple of 8"

    Vp = _round_up(V, 8)                  # per-field vocab, sublane aligned
    FVp = F * Vp
    cd = jnp.dtype(mxu_dtype)             # MXU operand dtype (f32 or bf16)

    # ---------------- fused constant matrix (R, F*Vp) ----------------
    t1p = jnp.pad(t1[:, :, 0].astype(jnp.float32), ((0, 0), (0, Vp - V)))   # (F,Vp)
    t2p = jnp.pad(t2.astype(jnp.float32), ((0, 0), (0, Vp - V), (0, 0)))    # (F,Vp,E)

    blkA = jnp.concatenate(                                                  # fm1 row
        [t1p.reshape(1, FVp), jnp.zeros((7, FVp), jnp.float32)], axis=0)     # (8,FVp)

    rows_fieldsum = jnp.transpose(t2p, (2, 0, 1)).reshape(E, FVp)            # (E,FVp)
    padB = _round_up(E, 8) - E
    blkB = jnp.concatenate(
        [rows_fieldsum, jnp.zeros((padB, FVp), jnp.float32)], axis=0)

    # Tmat[f*E+e, f*Vp+v] = t2[f, v, e]   (block diagonal over fields)
    t2T = jnp.swapaxes(t2p, 1, 2)                                            # (F,E,Vp)
    Tmat = jnp.einsum("fg,fev->fegv", jnp.eye(F, dtype=jnp.float32), t2T)
    Tmat = Tmat.reshape(FE, FVp)                                             # (FE,FVp)

    blkC = w1.astype(jnp.float32) @ Tmat                                     # (H1,FVp)
    blkD = Tmat                                                              # (FE,FVp)

    mega = jnp.concatenate([blkA, blkB, blkC, blkD], axis=0).astype(cd)
    off_s = 8
    off_h = 8 + (E + padB)
    off_x = off_h + H1
    R = off_x + FE

    w2_c = w2.astype(cd)

    # ---------------- batch tiling (lanes) ----------------
    b_round = _round_up(B, 128)
    tb = min(_round_up(block_b, 128), b_round)
    if tb >= b_round and b_round >= 256:
        # keep >= 2 grid steps so the "parallel" batch axis can use both v7x TCs
        tb = _round_up(b_round // 2, 128)
    nb = pl.cdiv(b_round, tb)
    B_pad = nb * tb

    # Pad the tiny feature-major inputs (NOT a large gathered tensor).
    idxT = jnp.pad(Xi[:, :, 0].T.astype(jnp.int32), ((0, 0), (0, B_pad - B)))  # (F,Bp)
    xvT = jnp.pad(Xv.T.astype(jnp.float32), ((0, 0), (0, B_pad - B)))          # (F,Bp)

    # ---------------- kernel ----------------
    def kernel(idx_ref, xv_ref, mega_ref, b1_ref, w2_ref, b2_ref, bias_ref, out_ref):
        TB = xv_ref.shape[1]

        # Xv-scaled one-hot over the padded per-field vocab: (F*Vp, TB).
        iota_v = lax.broadcasted_iota(jnp.int32, (Vp, TB), 0)
        blocks = []
        for f in range(F):                                   # F small & static
            idx_f = idx_ref[pl.ds(f, 1), :]                  # (1, TB) int32
            xv_f = xv_ref[pl.ds(f, 1), :].astype(cd)         # (1, TB)
            hit = idx_f == iota_v                            # (Vp, TB)
            blocks.append(jnp.where(hit, xv_f, 0.0))
        onehot = jnp.concatenate(blocks, axis=0)             # (F*Vp, TB), dtype cd

        # Single fused MXU pass: fm1 row, field sums, W1@x, and x itself.
        res = jnp.dot(mega_ref[...], onehot,
                      preferred_element_type=jnp.float32)    # (R, TB) f32

        fm1 = jnp.sum(res[0:8, :], axis=0, keepdims=True)    # rows 1..7 are zero
        s = res[off_s:off_h, :]                              # padded rows are zero
        x = res[off_x:off_x + FE, :]                         # scaled 2nd-order emb
        fm2 = 0.5 * (jnp.sum(s * s, axis=0, keepdims=True)
                     - jnp.sum(x * x, axis=0, keepdims=True))

        h = jnp.maximum(res[off_h:off_h + H1, :] + b1_ref[...], 0.0)   # (H1, TB)
        h = jnp.dot(w2_ref[...], h.astype(cd),
                    preferred_element_type=jnp.float32) + b2_ref[...]
        h = jnp.maximum(h, 0.0)
        deep = jnp.sum(h, axis=0, keepdims=True)             # (1, TB)

        out_ref[...] = fm1 + fm2 + deep + bias_ref[0, 0]

    tile = lambda rows: pl.BlockSpec((rows, tb), lambda i: (0, i))
    const = lambda shape: pl.BlockSpec(shape, lambda i: (0, 0))

    cost = pl.CostEstimate(
        flops=2 * (R * FVp + H2 * H1) * B_pad,
        transcendentals=0,
        bytes_accessed=(2 * F * 4 + 4) * B_pad
                       + mega.size * mega.dtype.itemsize
                       + (H1 + H2 * H1 + H2 + 1) * 4)

    out = pl.pallas_call(
        kernel,
        out_shape=jax.ShapeDtypeStruct((1, B_pad), jnp.float32),
        grid=(nb,),
        in_specs=[
            tile(F),                   # idxT  (streamed)
            tile(F),                   # xvT   (streamed)
            const((R, FVp)),           # fused constant matrix (VMEM-resident)
            const((H1, 1)),            # b1
            const((H2, H1)),           # w2
            const((H2, 1)),            # b2
            pl.BlockSpec(memory_space=pltpu.MemorySpace.SMEM),   # bias (1,1)
        ],
        out_specs=pl.BlockSpec((1, tb), lambda i: (0, i)),       # lane-dense row
        compiler_params=pltpu.CompilerParams(
            dimension_semantics=("parallel",),
            vmem_limit_bytes=32 * 1024 * 1024),
        cost_estimate=cost,
    )(idxT, xvT, mega, b1, w2_c, b2, bias)

    return out[0, :B]                                                      # (B,)


def deepfm_reference(Xi, Xv, params):
    """Pure-JAX reference mirroring the PyTorch forward (eval mode)."""
    t1, t2 = params["fm_first_tables"], params["fm_second_tables"]
    B, F, _ = Xi.shape
    idx = Xi[:, :, 0]
    first = jnp.stack([t1[i][idx[:, i], 0] * Xv[:, i] for i in range(F)], axis=1)
    second = jnp.stack([t2[i][idx[:, i]] * Xv[:, i, None] for i in range(F)], axis=1)
    s = second.sum(axis=1)
    sq = (second * second).sum(axis=1)
    fm2 = 0.5 * (s * s - sq)
    x = second.reshape(B, -1)
    h = jnp.maximum(x @ params["w1"].T + params["b1"][:, 0], 0.0)
    h = jnp.maximum(h @ params["w2"].T + params["b2"][:, 0], 0.0)
    return first.sum(1) + fm2.sum(1) + h.sum(1) + params["bias"][0, 0]


if __name__ == "__main__":
    # Config consistent with the module: field_size=8, feature_sizes=[10]*8,
    # embedding_size=4, deep_layers=[32, 32].  B=200 exercises batch padding and
    # (with block_b=128) a multi-step "parallel" grid.
    B, F, E, V = 200, 8, 4, 10
    H1, H2 = 32, 32

    key = jax.random.PRNGKey(0)
    keys = jax.random.split(key, 10)

    params = {
        "fm_first_tables": 0.1 * jax.random.normal(keys[0], (F, V, 1), jnp.float32),
        "fm_second_tables": 0.1 * jax.random.normal(keys[1], (F, V, E), jnp.float32),
        "w1": 0.1 * jax.random.normal(keys[2], (H1, F * E), jnp.float32),  # torch (out,in)
        "b1": 0.1 * jax.random.normal(keys[3], (H1, 1), jnp.float32),
        "w2": 0.1 * jax.random.normal(keys[4], (H2, H1), jnp.float32),
        "b2": 0.1 * jax.random.normal(keys[5], (H2, 1), jnp.float32),
        "bias": jax.random.normal(keys[6], (1, 1), jnp.float32),
    }

    Xi = jax.random.randint(keys[7], (B, F, 1), 0, V, dtype=jnp.int32)
    Xv = jax.random.uniform(keys[8], (B, F), jnp.float32)

    ref = jax.block_until_ready(deepfm_reference(Xi, Xv, params))

    fwd = jax.jit(deepfm_forward, static_argnames=("block_b", "mxu_dtype"))

    # f32 MXU path (portable, strict accuracy); small block to exercise multi-tile
    # grid + batch padding.
    out = jax.block_until_ready(fwd(Xi, Xv, params, block_b=128))
    assert out.shape == (B,)
    assert jnp.allclose(out, ref, atol=1e-4, rtol=1e-4), (out, ref)

    # bf16-MXU-operand path (v6e/v7x fast path; f32 accumulation) with the default
    # (large) batch tile -> looser tolerance vs the f32 reference.
    out_bf16 = jax.block_until_ready(fwd(Xi, Xv, params, mxu_dtype=jnp.bfloat16))
    assert out_bf16.shape == (B,)
    assert jnp.max(jnp.abs(out_bf16 - ref)) < 1e-1, (out_bf16, ref)

    print("KERNEL_OK")
</pallas_src>

<mosaic_0001>
module attributes {stable_mosaic.version = 11 : i64} {
  func.func @kernel(%arg0: i32, %arg1: memref<8x128xi32, #tpu.memory_space<vmem>>, %arg2: memref<8x128xf32, #tpu.memory_space<vmem>>, %arg3: memref<80x128xf32, #tpu.memory_space<vmem>>, %arg4: memref<32x1xf32, #tpu.memory_space<vmem>>, %arg5: memref<32x32xf32, #tpu.memory_space<vmem>>, %arg6: memref<32x1xf32, #tpu.memory_space<vmem>>, %arg7: memref<1x1xf32, #tpu.memory_space<smem>>, %arg8: memref<1x128xf32, #tpu.memory_space<vmem>>) attributes {dimension_semantics = [#tpu.dimension_semantics<parallel>], iteration_bounds = array<i64: 2>, scalar_prefetch = 0 : i64, scratch_operands = 0 : i64, tpu.core_type = #tpu.core_type<tc>, window_params = [{transform_indices = @transform_0, window_bounds = array<i64: 8, 128>}, {transform_indices = @transform_1, window_bounds = array<i64: 8, 128>}, {pipeline_mode = #tpu.pipeline_mode<synchronous>, transform_indices = @transform_2, window_bounds = array<i64: 80, 128>}, {pipeline_mode = #tpu.pipeline_mode<synchronous>, transform_indices = @transform_3, window_bounds = array<i64: 32, 1>}, {pipeline_mode = #tpu.pipeline_mode<synchronous>, transform_indices = @transform_4, window_bounds = array<i64: 32, 32>}, {pipeline_mode = #tpu.pipeline_mode<synchronous>, transform_indices = @transform_5, window_bounds = array<i64: 32, 1>}, {transform_indices = @transform_6, window_bounds = array<i64: 1, 1>}, {transform_indices = @transform_7, window_bounds = array<i64: 1, 128>}]} {
    %0 = tpu.iota {dimensions = array<i32: 0>} : vector<16x128xi32>
    %c0 = arith.constant 0 : index
    %c0_0 = arith.constant 0 : index
    %1 = vector.load %arg1[%c0, %c0_0] : memref<8x128xi32, #tpu.memory_space<vmem>>, vector<1x128xi32>
    %c0_1 = arith.constant 0 : index
    %c0_2 = arith.constant 0 : index
    %2 = vector.load %arg2[%c0_1, %c0_2] : memref<8x128xf32, #tpu.memory_space<vmem>>, vector<1x128xf32>
    %3 = vector.broadcast %1 : vector<1x128xi32> to vector<16x128xi32>
    %4 = arith.cmpi eq, %3, %0 : vector<16x128xi32>
    %cst = arith.constant 0.000000e+00 : f32
    %5 = vector.shape_cast %2 : vector<1x128xf32> to vector<1x128xf32>
    %6 = vector.broadcast %5 : vector<1x128xf32> to vector<16x128xf32>
    %7 = vector.broadcast %cst : f32 to vector<16x128xf32>
    %8 = arith.select %4, %6, %7 : vector<16x128xi1>, vector<16x128xf32>
    %c1 = arith.constant 1 : index
    %c0_3 = arith.constant 0 : index
    %9 = vector.load %arg1[%c1, %c0_3] : memref<8x128xi32, #tpu.memory_space<vmem>>, vector<1x128xi32>
    %c1_4 = arith.constant 1 : index
    %c0_5 = arith.constant 0 : index
    %10 = vector.load %arg2[%c1_4, %c0_5] : memref<8x128xf32, #tpu.memory_space<vmem>>, vector<1x128xf32>
    %11 = vector.broadcast %9 : vector<1x128xi32> to vector<16x128xi32>
    %12 = arith.cmpi eq, %11, %0 : vector<16x128xi32>
    %cst_6 = arith.constant 0.000000e+00 : f32
    %13 = vector.shape_cast %10 : vector<1x128xf32> to vector<1x128xf32>
    %14 = vector.broadcast %13 : vector<1x128xf32> to vector<16x128xf32>
    %15 = vector.broadcast %cst_6 : f32 to vector<16x128xf32>
    %16 = arith.select %12, %14, %15 : vector<16x128xi1>, vector<16x128xf32>
    %c2 = arith.constant 2 : index
    %c0_7 = arith.constant 0 : index
    %17 = vector.load %arg1[%c2, %c0_7] : memref<8x128xi32, #tpu.memory_space<vmem>>, vector<1x128xi32>
    %c2_8 = arith.constant 2 : index
    %c0_9 = arith.constant 0 : index
    %18 = vector.load %arg2[%c2_8, %c0_9] : memref<8x128xf32, #tpu.memory_space<vmem>>, vector<1x128xf32>
    %19 = vector.broadcast %17 : vector<1x128xi32> to vector<16x128xi32>
    %20 = arith.cmpi eq, %19, %0 : vector<16x128xi32>
    %cst_10 = arith.constant 0.000000e+00 : f32
    %21 = vector.shape_cast %18 : vector<1x128xf32> to vector<1x128xf32>
    %22 = vector.broadcast %21 : vector<1x128xf32> to vector<16x128xf32>
    %23 = vector.broadcast %cst_10 : f32 to vector<16x128xf32>
    %24 = arith.select %20, %22, %23 : vector<16x128xi1>, vector<16x128xf32>
    %c3 = arith.constant 3 : index
    %c0_11 = arith.constant 0 : index
    %25 = vector.load %arg1[%c3, %c0_11] : memref<8x128xi32, #tpu.memory_space<vmem>>, vector<1x128xi32>
    %c3_12 = arith.constant 3 : index
    %c0_13 = arith.constant 0 : index
    %26 = vector.load %arg2[%c3_12, %c0_13] : memref<8x128xf32, #tpu.memory_space<vmem>>, vector<1x128xf32>
    %27 = vector.broadcast %25 : vector<1x128xi32> to vector<16x128xi32>
    %28 = arith.cmpi eq, %27, %0 : vector<16x128xi32>
    %cst_14 = arith.constant 0.000000e+00 : f32
    %29 = vector.shape_cast %26 : vector<1x128xf32> to vector<1x128xf32>
    %30 = vector.broadcast %29 : vector<1x128xf32> to vector<16x128xf32>
    %31 = vector.broadcast %cst_14 : f32 to vector<16x128xf32>
    %32 = arith.select %28, %30, %31 : vector<16x128xi1>, vector<16x128xf32>
    %c4 = arith.constant 4 : index
    %c0_15 = arith.constant 0 : index
    %33 = vector.load %arg1[%c4, %c0_15] : memref<8x128xi32, #tpu.memory_space<vmem>>, vector<1x128xi32>
    %c4_16 = arith.constant 4 : index
    %c0_17 = arith.constant 0 : index
    %34 = vector.load %arg2[%c4_16, %c0_17] : memref<8x128xf32, #tpu.memory_space<vmem>>, vector<1x128xf32>
    %35 = vector.broadcast %33 : vector<1x128xi32> to vector<16x128xi32>
    %36 = arith.cmpi eq, %35, %0 : vector<16x128xi32>
    %cst_18 = arith.constant 0.000000e+00 : f32
    %37 = vector.shape_cast %34 : vector<1x128xf32> to vector<1x128xf32>
    %38 = vector.broadcast %37 : vector<1x128xf32> to vector<16x128xf32>
    %39 = vector.broadcast %cst_18 : f32 to vector<16x128xf32>
    %40 = arith.select %36, %38, %39 : vector<16x128xi1>, vector<16x128xf32>
    %c5 = arith.constant 5 : index
    %c0_19 = arith.constant 0 : index
    %41 = vector.load %arg1[%c5, %c0_19] : memref<8x128xi32, #tpu.memory_space<vmem>>, vector<1x128xi32>
    %c5_20 = arith.constant 5 : index
    %c0_21 = arith.constant 0 : index
    %42 = vector.load %arg2[%c5_20, %c0_21] : memref<8x128xf32, #tpu.memory_space<vmem>>, vector<1x128xf32>
    %43 = vector.broadcast %41 : vector<1x128xi32> to vector<16x128xi32>
    %44 = arith.cmpi eq, %43, %0 : vector<16x128xi32>
    %cst_22 = arith.constant 0.000000e+00 : f32
    %45 = vector.shape_cast %42 : vector<1x128xf32> to vector<1x128xf32>
    %46 = vector.broadcast %45 : vector<1x128xf32> to vector<16x128xf32>
    %47 = vector.broadcast %cst_22 : f32 to vector<16x128xf32>
    %48 = arith.select %44, %46, %47 : vector<16x128xi1>, vector<16x128xf32>
    %c6 = arith.constant 6 : index
    %c0_23 = arith.constant 0 : index
    %49 = vector.load %arg1[%c6, %c0_23] : memref<8x128xi32, #tpu.memory_space<vmem>>, vector<1x128xi32>
    %c6_24 = arith.constant 6 : index
    %c0_25 = arith.constant 0 : index
    %50 = vector.load %arg2[%c6_24, %c0_25] : memref<8x128xf32, #tpu.memory_space<vmem>>, vector<1x128xf32>
    %51 = vector.broadcast %49 : vector<1x128xi32> to vector<16x128xi32>
    %52 = arith.cmpi eq, %51, %0 : vector<16x128xi32>
    %cst_26 = arith.constant 0.000000e+00 : f32
    %53 = vector.shape_cast %50 : vector<1x128xf32> to vector<1x128xf32>
    %54 = vector.broadcast %53 : vector<1x128xf32> to vector<16x128xf32>
    %55 = vector.broadcast %cst_26 : f32 to vector<16x128xf32>
    %56 = arith.select %52, %54, %55 : vector<16x128xi1>, vector<16x128xf32>
    %c7 = arith.constant 7 : index
    %c0_27 = arith.constant 0 : index
    %57 = vector.load %arg1[%c7, %c0_27] : memref<8x128xi32, #tpu.memory_space<vmem>>, vector<1x128xi32>
    %c7_28 = arith.constant 7 : index
    %c0_29 = arith.constant 0 : index
    %58 = vector.load %arg2[%c7_28, %c0_29] : memref<8x128xf32, #tpu.memory_space<vmem>>, vector<1x128xf32>
    %59 = vector.broadcast %57 : vector<1x128xi32> to vector<16x128xi32>
    %60 = arith.cmpi eq, %59, %0 : vector<16x128xi32>
    %cst_30 = arith.constant 0.000000e+00 : f32
    %61 = vector.shape_cast %58 : vector<1x128xf32> to vector<1x128xf32>
    %62 = vector.broadcast %61 : vector<1x128xf32> to vector<16x128xf32>
    %63 = vector.broadcast %cst_30 : f32 to vector<16x128xf32>
    %64 = arith.select %60, %62, %63 : vector<16x128xi1>, vector<16x128xf32>
    %65 = tpu.concatenate %8, %16, %24, %32, %40, %48, %56, %64 in 0 : vector<16x128xf32>, vector<16x128xf32>, vector<16x128xf32>, vector<16x128xf32>, vector<16x128xf32>, vector<16x128xf32>, vector<16x128xf32>, vector<16x128xf32> -> vector<128x128xf32>
    %c0_31 = arith.constant 0 : index
    %c0_32 = arith.constant 0 : index
    %66 = vector.load %arg3[%c0_31, %c0_32] : memref<80x128xf32, #tpu.memory_space<vmem>>, vector<80x128xf32>
    %cst_33 = arith.constant dense<0.000000e+00> : vector<80x128xf32>
    %67 = tpu.matmul %66, %65, %cst_33 {dimension_numbers = #tpu.dot_dimension_numbers<[1], [0], [0], [1], [0, 0, 1, 1], [], []>} : vector<80x128xf32>, vector<128x128xf32>, vector<80x128xf32> -> vector<80x128xf32>
    %68 = vector.extract_strided_slice %67 {offsets = [0, 0], sizes = [8, 128], strides = [1, 1]} : vector<80x128xf32> to vector<8x128xf32>
    %cst_34 = arith.constant dense<0.000000e+00> : vector<128xf32>
    %69 = vector.multi_reduction <add>, %68, %cst_34 [0] : vector<8x128xf32> to vector<128xf32>
    %70 = vector.shape_cast %69 : vector<128xf32> to vector<1x128xf32>
    %71 = vector.extract_strided_slice %67 {offsets = [8, 0], sizes = [8, 128], strides = [1, 1]} : vector<80x128xf32> to vector<8x128xf32>
    %72 = vector.extract_strided_slice %67 {offsets = [48, 0], sizes = [32, 128], strides = [1, 1]} : vector<80x128xf32> to vector<32x128xf32>
    %73 = arith.mulf %71, %71 : vector<8x128xf32>
    %cst_35 = arith.constant dense<0.000000e+00> : vector<128xf32>
    %74 = vector.multi_reduction <add>, %73, %cst_35 [0] : vector<8x128xf32> to vector<128xf32>
    %75 = vector.shape_cast %74 : vector<128xf32> to vector<1x128xf32>
    %76 = arith.mulf %72, %72 : vector<32x128xf32>
    %cst_36 = arith.constant dense<0.000000e+00> : vector<128xf32>
    %77 = vector.multi_reduction <add>, %76, %cst_36 [0] : vector<32x128xf32> to vector<128xf32>
    %78 = vector.shape_cast %77 : vector<128xf32> to vector<1x128xf32>
    %79 = arith.subf %75, %78 : vector<1x128xf32>
    %cst_37 = arith.constant 5.000000e-01 : f32
    %80 = vector.broadcast %cst_37 : f32 to vector<1x128xf32>
    %81 = arith.mulf %80, %79 : vector<1x128xf32>
    %82 = vector.extract_strided_slice %67 {offsets = [16, 0], sizes = [32, 128], strides = [1, 1]} : vector<80x128xf32> to vector<32x128xf32>
    %c0_38 = arith.constant 0 : index
    %c0_39 = arith.constant 0 : index
    %83 = vector.load %arg4[%c0_38, %c0_39] : memref<32x1xf32, #tpu.memory_space<vmem>>, vector<32x1xf32>
    %84 = vector.broadcast %83 : vector<32x1xf32> to vector<32x128xf32>
    %85 = arith.addf %82, %84 : vector<32x128xf32>
    %cst_40 = arith.constant 0.000000e+00 : f32
    %86 = vector.broadcast %cst_40 : f32 to vector<32x128xf32>
    %87 = arith.maximumf %85, %86 : vector<32x128xf32>
    %c0_41 = arith.constant 0 : index
    %c0_42 = arith.constant 0 : index
    %88 = vector.load %arg5[%c0_41, %c0_42] : memref<32x32xf32, #tpu.memory_space<vmem>>, vector<32x32xf32>
    %cst_43 = arith.constant dense<0.000000e+00> : vector<32x128xf32>
    %89 = tpu.matmul %88, %87, %cst_43 {dimension_numbers = #tpu.dot_dimension_numbers<[1], [0], [0], [1], [0, 0, 1, 1], [], []>} : vector<32x32xf32>, vector<32x128xf32>, vector<32x128xf32> -> vector<32x128xf32>
    %c0_44 = arith.constant 0 : index
    %c0_45 = arith.constant 0 : index
    %90 = vector.load %arg6[%c0_44, %c0_45] : memref<32x1xf32, #tpu.memory_space<vmem>>, vector<32x1xf32>
    %91 = vector.broadcast %90 : vector<32x1xf32> to vector<32x128xf32>
    %92 = arith.addf %89, %91 : vector<32x128xf32>
    %cst_46 = arith.constant 0.000000e+00 : f32
    %93 = vector.broadcast %cst_46 : f32 to vector<32x128xf32>
    %94 = arith.maximumf %92, %93 : vector<32x128xf32>
    %cst_47 = arith.constant dense<0.000000e+00> : vector<128xf32>
    %95 = vector.multi_reduction <add>, %94, %cst_47 [0] : vector<32x128xf32> to vector<128xf32>
    %96 = vector.shape_cast %95 : vector<128xf32> to vector<1x128xf32>
    %97 = arith.addf %70, %81 : vector<1x128xf32>
    %98 = arith.addf %97, %96 : vector<1x128xf32>
    %c0_48 = arith.constant 0 : index
    %c0_49 = arith.constant 0 : index
    %99 = memref.load %arg7[%c0_48, %c0_49] : memref<1x1xf32, #tpu.memory_space<smem>>
    %100 = vector.broadcast %99 : f32 to vector<1x128xf32>
    %101 = arith.addf %98, %100 : vector<1x128xf32>
    %c0_50 = arith.constant 0 : index
    %c0_51 = arith.constant 0 : index
    %102 = vector.load %arg8[%c0_50, %c0_51] : memref<1x128xf32, #tpu.memory_space<vmem>>, vector<1x128xf32>
    tpu.vector_store %arg8[%c0_50, %c0_51], %101 {strides = array<i32>} : memref<1x128xf32, #tpu.memory_space<vmem>>, vector<1x128xf32>,
    return
  }
  func.func @transform_0(%arg0: i32) -> (i32, i32) {
    %c0_i32 = arith.constant 0 : i32
    %c0_i32_0 = arith.constant 0 : i32
    return %c0_i32, %arg0 : i32, i32
  }
  func.func @transform_1(%arg0: i32) -> (i32, i32) {
    %c0_i32 = arith.constant 0 : i32
    %c0_i32_0 = arith.constant 0 : i32
    return %c0_i32, %arg0 : i32, i32
  }
  func.func @transform_2(%arg0: i32) -> (i32, i32) {
    %c0_i32 = arith.constant 0 : i32
    %c0_i32_0 = arith.constant 0 : i32
    %c0_i32_1 = arith.constant 0 : i32
    return %c0_i32, %c0_i32_0 : i32, i32
  }
  func.func @transform_3(%arg0: i32) -> (i32, i32) {
    %c0_i32 = arith.constant 0 : i32
    %c0_i32_0 = arith.constant 0 : i32
    %c0_i32_1 = arith.constant 0 : i32
    return %c0_i32, %c0_i32_0 : i32, i32
  }
  func.func @transform_4(%arg0: i32) -> (i32, i32) {
    %c0_i32 = arith.constant 0 : i32
    %c0_i32_0 = arith.constant 0 : i32
    %c0_i32_1 = arith.constant 0 : i32
    return %c0_i32, %c0_i32_0 : i32, i32
  }
  func.func @transform_5(%arg0: i32) -> (i32, i32) {
    %c0_i32 = arith.constant 0 : i32
    %c0_i32_0 = arith.constant 0 : i32
    %c0_i32_1 = arith.constant 0 : i32
    return %c0_i32, %c0_i32_0 : i32, i32
  }
  func.func @transform_6(%arg0: i32) -> (i32, i32) {
    %c0_i32 = arith.constant 0 : i32
    %c0_i32_0 = arith.constant 0 : i32
    %c0_i32_1 = arith.constant 0 : i32
    return %c0_i32, %c0_i32_0 : i32, i32
  }
  func.func @transform_7(%arg0: i32) -> (i32, i32) {
    %c0_i32 = arith.constant 0 : i32
    %c0_i32_0 = arith.constant 0 : i32
    return %c0_i32, %arg0 : i32, i32
  }
}

</mosaic_0001>

<bundles_post_ra>
// kernel: deepfm_forward.1
= control target key start
LH: loop header
LB: loop body
LE: loop exit
PB: predicated region body
PF: predicated region fallthrough
CT: control target
= control target key end

     0   :  { %s1306_s0 = inlined_call_operand.vmem [shape: s32[8,256], index: 0, kind: input, shape index: {}]   ;;  %s1307_s1 = inlined_call_operand.vmem [shape: f32[8,256], index: 1, kind: input, shape index: {}]   ;;  %s1308_s2 = inlined_call_operand.vmem [shape: f32[80,128], index: 2, kind: input, shape index: {}]   ;;  %s1309_s3 = inlined_call_operand.vmem [shape: f32[32,1], index: 3, kind: input, shape index: {}]   ;;  %s1310_s4 = inlined_call_operand.vmem [shape: f32[32,32], index: 4, kind: input, shape index: {}]   ;;  %s1311_s5 = inlined_call_operand.vmem [shape: f32[32,1], index: 5, kind: input, shape index: {}]   ;;  %s1312_s6 = inlined_call_operand.<no memory space> [shape: f32[1,1], index: 6, kind: input, shape index: {}]   ;;  %s1313_s7 = inlined_call_operand.hbm [shape: f32[1,256], index: 7, kind: output, shape index: {}]  }
   0x1   :  { %12 = sst [smem:[#allocation2]] %s1312_s6 }
   0x2   :  { %13 = vsyncpa [#allocation4], 0 }
   0x3   :  { %15 = vsyncpa [#allocation4 + $0x1], 0  ;;  %s1105_s26 = smov 0   ;;  %s1107_s27 = smov 0  }
   0x4   :  { %s1109_s28 = smov 0   ;;  %s1111_s29 = smov 0  }
   0x5 LB: > { %s1126_s6 = sadd.s32 4294967295, %s1058_s29   ;;  %s816_s30 = sadd.s32 4294967294, %s1058_s29   ;;  %s1058_s29 = sphi %s1111_s29, %s1319_s29   ;;  %s1054_s28 = sphi %s1109_s28, %s1318_s28   ;;  %s1050_s27 = sphi %s1107_s27, %s1317_s27   ;;  %s1046_s26 = sphi %s1105_s26, %s1316_s26  }
   0x6   : > { %s1130_s8 = sadd.s32 1, %s1058_s29   ;;  %s185_s9 = sadd.s32 1, %s1054_s28 }
   0x7   : > { %s182_s10 = ssub.s32 %s1058_s29, %s1130_s8  ;;  %p195_p0 = scmp.ne.s32.totalorder %s1054_s28, %s1050_s27 }
   0x8   : > { %p183_p1 = scmp.eq.s32.totalorder %s182_s10, 0  ;;  %p196_p2 = scmp.eq.s32.totalorder %s1126_s6, 1 }
   0x9   : > { %p201_p3 = scmp.ne.s32.totalorder %s1050_s27, %s1046_s26  ;;  %p202_p4 = scmp.eq.s32.totalorder %s816_s30, 1 }
   0xa   : > { %s1141_s11 = scalar_select %p183_p1, %s1054_s28, %s185_s9  }
   0xb   : > { %p1143_p5 = por %p196_p2, %p195_p0  ;;  %p1147_p6 = por %p202_p4, %p201_p3 }
   0xc   : > { %p819_p7 = scmp.ge.s32.totalorder %s1058_s29, 1  ;;  %p249_p8 = scmp.lt.s32.totalorder %s1058_s29, 3 }
   0xe   : > { %p250_p9 = pnand %p819_p7, %p249_p8 }
   0xf   : > { %p283_p10 = scmp.lt.s32.totalorder (!%p250_p9), %s1126_s6, 1  ;;  %s732_s21 = sld [smem:[#allocation2]] (!%p250_p9) }
  0x10   : > { %253 = sbr.rel (%p250_p9) target bundleno = 509 (0x1fd), region = 48  ;;  %s281_s22 = sand.u32 (!%p250_p9), 1, %s1050_s27  }
  0x11   : > { %s858_s23 = sshll.u32 (!%p250_p9), %s1126_s6, 4  ;;  %s282_s25 = scalar_lea.vmem (!%p250_p9), [#allocation3], %s281_s22 }
  0x12   : > { %s749_s30 = sshll.u32 (!%p250_p9), %s282_s25, 4  ;;  %s747_s14 = scalar_lea.hbm (!%p250_p9), %s1313_s7, %s858_s23  ;;  %s750_s30 = int_to_ptr.vmem [resolvable:$true] %s749_s30 }
  0x13   : > { %s998_s15 = scalar_lea.vmem (!%p250_p9), %s750_s30, 16 }
  0x14   : > { %p999_p11 = scmp.ne.s32.totalorder (!%p250_p9), %s750_s30, %s998_s15 }
  0x15   : > { %v291_v0 = vlaneseq  ;;  %v406_v1 = vld [vmem:[%s1308_s2] sm:$0xff]  ;;  %v1060_v2 = vmov 0   ;;  %s284_s16 = scalar_select %p283_p10, %s1126_s6, 1  ;;  %v562_v4 = vld [vmem:[%s1309_s3 + $0x18] sm:$0xff]  ;;  %v560_v6 = vld [vmem:[%s1309_s3 + $0x8] sm:$0xff] }
  0x16   : > { %927 = vmatprep.mubr.f32.mxu0 %v406_v1  ;;  %996 = vset.pattern.permute.xlu0 %v1060_v2  ;;  %v561_v7 = vld [vmem:[%s1309_s3 + $0x10] sm:$0xff]  ;;  %v559_v11 = vld [vmem:[%s1309_s3] sm:$0xff]  ;;  %v596_v15 = vld [vmem:[%s1311_s5 + $0x8] sm:$0xff]  ;;  %p1000_p12 = pnand %p999_p11, %p1143_p5 }
  0x17   : > { %v1158_v3 = vshrl.u32 %v291_v0, 7  ;;  %997 = vset.pattern.permute.xlu1 %v1060_v2  ;;  %s820_s19 = sshll.u32 %s284_s16, 3  ;;  %580 = vperm.xlu0 %996, %v562_v4   ;;  %v595_v13 = vld [vmem:[%s1311_s5] sm:$0xff]  ;;  %v597_v17 = vld [vmem:[%s1311_s5 + $0x10] sm:$0xff]  ;;  %v598_v19 = vld [vmem:[%s1311_s5 + $0x18] sm:$0xff]  ;;  %s1061_s16 = smov [#allocation3]  }
  0x18   : > { %s1172_s24 = scalar_lea.vmem %s1306_s0, %s820_s19  ;;  %s1177_s9 = scalar_lea.vmem %s1307_s1, %s820_s19  ;;  %570 = vperm.xlu1 %997, %v560_v6   ;;  %v407_v29 = vld [vmem:[%s1308_s2 + $0x8] sm:$0xff]  ;;  %v408_v30 = vld [vmem:[%s1308_s2 + $0x10] sm:$0xff]  ;;  %v409_v31 = vld [vmem:[%s1308_s2 + $0x18] sm:$0xff] }
  0x19   : > { %v1164_v5 = vadd.s32 8, %v1158_v3  ;;  %v836_v8 = vld [vmem:[%s1172_s24 + $0x7] ss:$0 sm:$0xff]  ;;  %v834_v10 = vld [vmem:[%s1172_s24 + $0x6] ss:$0 sm:$0xff]  ;;  %v411_v33 = vld [vmem:[%s1308_s2 + $0x28] sm:$0xff]  ;;  %p1001_p13 = pneg %p1000_p12 }
  0x1a   : > { %v837_v9 = vld [vmem:[%s1177_s9 + $0x7] ss:$0 sm:$0xff]  ;;  %vm398_vm0 = vcmp.eq.s32.totalorder %v836_v8, %v1158_v3  ;;  %v835_v12 = vld [vmem:[%s1177_s9 + $0x6] ss:$0 sm:$0xff]  ;;  %v832_v14 = vld [vmem:[%s1172_s24 + $0x5] ss:$0 sm:$0xff]  ;;  %vm384_vm3 = vcmp.eq.s32.totalorder %v834_v10, %v1158_v3 }
  0x1b   : > { %vm399_vm1 = vcmp.eq.s32.totalorder %v836_v8, %v1164_v5  ;;  %575 = vperm.xlu0 %996, %v561_v7   ;;  %vm385_vm2 = vcmp.eq.s32.totalorder %v834_v10, %v1164_v5  ;;  %v833_v16 = vld [vmem:[%s1177_s9 + $0x5] ss:$0 sm:$0xff]  ;;  %vm371_vm4 = vcmp.eq.s32.totalorder %v832_v14, %v1164_v5  ;;  %v830_v18 = vld [vmem:[%s1172_s24 + $0x4] ss:$0 sm:$0xff]  ;;  %vm370_vm5 = vcmp.eq.s32.totalorder %v832_v14, %v1158_v3  ;;  %v828_v21 = vld [vmem:[%s1172_s24 + $0x3] ss:$0 sm:$0xff] }
  0x1c   : > { %895 = vmatprep.subr.msk.mxu0 %vm399_vm1, %v837_v9  ;;  %565 = vperm.xlu1 %997, %v559_v11   ;;  %v831_v20 = vld [vmem:[%s1177_s9 + $0x4] ss:$0 sm:$0xff]  ;;  %vm357_vm6 = vcmp.eq.s32.totalorder %v830_v18, %v1164_v5  ;;  %vm356_vm7 = vcmp.eq.s32.totalorder %v830_v18, %v1158_v3  ;;  %v829_v22 = vld [vmem:[%s1177_s9 + $0x3] ss:$0 sm:$0xff]  ;;  %vm343_vm8 = vcmp.eq.s32.totalorder %v828_v21, %v1164_v5  ;;  %v826_v23 = vld [vmem:[%s1172_s24 + $0x2] ss:$0 sm:$0xff] }
  0x1d   : > { %896 = vmatpush3.msk.msra.mxu0 %vm399_vm1, %v837_v9  ;;  %vm342_vm9 = vcmp.eq.s32.totalorder %v828_v21, %v1158_v3  ;;  %v827_v24 = vld [vmem:[%s1177_s9 + $0x2] ss:$0 sm:$0xff]  ;;  %vm329_vm10 = vcmp.eq.s32.totalorder %v826_v23, %v1164_v5  ;;  %v824_v25 = vld [vmem:[%s1172_s24 + $0x1] ss:$0 sm:$0xff]  ;;  %vm328_vm11 = vcmp.eq.s32.totalorder %v826_v23, %v1158_v3  ;;  %v822_v27 = vld [vmem:[%s1172_s24] ss:$0 sm:$0xff] }
  0x1e   : > { %897 = vmatprep.subr.msk.mxu0 %vm398_vm0, %v837_v9  ;;  %v825_v26 = vld [vmem:[%s1177_s9 + $0x1] ss:$0 sm:$0xff]  ;;  %vm315_vm12 = vcmp.eq.s32.totalorder %v824_v25, %v1164_v5  ;;  %vm314_vm13 = vcmp.eq.s32.totalorder %v824_v25, %v1158_v3  ;;  %v823_v28 = vld [vmem:[%s1177_s9] ss:$0 sm:$0xff]  ;;  %vm301_vm14 = vcmp.eq.s32.totalorder %v822_v27, %v1164_v5  ;;  %vm300_vm15 = vcmp.eq.s32.totalorder %v822_v27, %v1158_v3  ;;  %v412_v34 = vld [vmem:[%s1308_s2 + $0x30] sm:$0xff]  ;;  %s737_s9 = scalar_lea.sflag [#allocation4], %s281_s22 }
  0x1f   : > { %898 = vmatpush3.msk.msra.mxu0 %vm398_vm0, %v837_v9  ;;  %601 = vperm.xlu0 %996, %v595_v13   ;;  %v410_v32 = vld [vmem:[%s1308_s2 + $0x20] sm:$0xff]  ;;  %v413_v35 = vld [vmem:[%s1308_s2 + $0x38] sm:$0xff]  ;;  %v415_v37 = vld [vmem:[%s1308_s2 + $0x48] sm:$0xff]  ;;  %vm619_vm0 = vcmask 261120   ;;  %s1002_s17 = sshll.u32 %s1061_s16, 4  ;;  %s1003_s17 = int_to_ptr.vmem [resolvable:$false] %s1002_s17 }
  0x20   : > { %899 = vmatprep.subr.msk.mxu0 %vm385_vm2, %v835_v12  ;;  %606 = vperm.xlu1 %997, %v596_v15   ;;  %v414_v36 = vld [vmem:[%s1308_s2 + $0x40] sm:$0xff]  ;;  %v592_v2 = vld [vmem:[%s1310_s4 + $0x8] sm:$0xff]  ;;  %v593_v7 = vld [vmem:[%s1310_s4 + $0x10] sm:$0xff]  ;;  %s1004_s6 = scalar_lea.vmem %s1003_s17, 32  ;;  %p1005_p0 = scmp.lt.s32.totalorder %s750_s30, %s1003_s17 }
  0x21   : > { %900 = vmatpush3.msk.msra.mxu0 %vm385_vm2, %v835_v12  ;;  %v591_v38 = vld [vmem:[%s1310_s4] sm:$0xff]  ;;  %v594_v9 = vld [vmem:[%s1310_s4 + $0x18] sm:$0xff]  ;;  %p1006_p1 = scmp.lt.s32.totalorder %s1004_s6, %s998_s15 }
  0x22   : > { %901 = vmatprep.subr.msk.mxu0 %vm384_vm3, %v835_v12  ;;  %950 = vmatprep.mubr.msk.f32.mxu1 %vm619_vm0, %v591_v38 }
  0x23   : > { %902 = vmatpush3.msk.msra.mxu0 %vm384_vm3, %v835_v12  ;;  %611 = vperm.xlu0 %996, %v597_v17   ;;  %p1007_p2 = por %p1006_p1, %p1005_p0 }
  0x24   : > { %903 = vmatprep.subr.msk.mxu0 %vm371_vm4, %v833_v16  ;;  %616 = vperm.xlu1 %997, %v598_v19  }
  0x25   : > { %904 = vmatpush3.msk.msra.mxu0 %vm371_vm4, %v833_v16  ;;  %p1008_p3 = pnand %p1007_p2, %p1001_p13 }
  0x26   : > { %905 = vmatprep.subr.msk.mxu0 %vm370_vm5, %v833_v16 }
  0x27   : > { %906 = vmatpush3.msk.msra.mxu0 %vm370_vm5, %v833_v16 }
  0x28   : > { %907 = vmatprep.subr.msk.mxu0 %vm357_vm6, %v831_v20 }
  0x29   : > { %908 = vmatpush3.msk.msra.mxu0 %vm357_vm6, %v831_v20 }
  0x2a   : > { %909 = vmatprep.subr.msk.mxu0 %vm356_vm7, %v831_v20 }
  0x2b   : > { %910 = vmatpush3.msk.msra.mxu0 %vm356_vm7, %v831_v20 }
  0x2c   : > { %911 = vmatprep.subr.msk.mxu0 %vm343_vm8, %v829_v22 }
  0x2d   : > { %912 = vmatpush3.msk.msra.mxu0 %vm343_vm8, %v829_v22 }
  0x2e   : > { %913 = vmatprep.subr.msk.mxu0 %vm342_vm9, %v829_v22 }
  0x2f   : > { %914 = vmatpush3.msk.msra.mxu0 %vm342_vm9, %v829_v22 }
  0x30   : > { %915 = vmatprep.subr.msk.mxu0 %vm329_vm10, %v827_v24 }
  0x31   : > { %916 = vmatpush3.msk.msra.mxu0 %vm329_vm10, %v827_v24 }
  0x32   : > { %917 = vmatprep.subr.msk.mxu0 %vm328_vm11, %v827_v24 }
  0x33   : > { %918 = vmatpush3.msk.msra.mxu0 %vm328_vm11, %v827_v24 }
  0x34   : > { %919 = vmatprep.subr.msk.mxu0 %vm315_vm12, %v825_v26 }
  0x35   : > { %920 = vmatpush3.msk.msra.mxu0 %vm315_vm12, %v825_v26 }
  0x36   : > { %921 = vmatprep.subr.msk.mxu0 %vm314_vm13, %v825_v26 }
  0x37   : > { %922 = vmatpush3.msk.msra.mxu0 %vm314_vm13, %v825_v26 }
  0x38   : > { %923 = vmatprep.subr.msk.mxu0 %vm301_vm14, %v823_v28 }
  0x39   : > { %924 = vmatpush3.msk.msra.mxu0 %vm301_vm14, %v823_v28 }
  0x3a   : > { %925 = vmatprep.subr.msk.mxu0 %vm300_vm15, %v823_v28 }
  0x3b   : > { %926 = vmatpush3.msk.msra.mxu0 %vm300_vm15, %v823_v28 }
  0x3c   : > { %928 = vmatmul.mubr.f32.vlgmr.msra.gmra.mxu0 %v407_v29 }
  0x3d   : > { %930 = vmatprep.mubr.f32.mxu0 %v408_v30 }
  0x40   : > { %931 = vmatmul.mubr.f32.gmra.mxu0 %v409_v31 }
  0x41   : > { %933 = vmatprep.mubr.f32.mxu0 %v410_v32 }
  0x44   : > { %934 = vmatmul.mubr.f32.gmra.mxu0 %v411_v33 }
  0x45   : > { %936 = vmatprep.mubr.f32.mxu0 %v412_v34 }
  0x48   : > { %937 = vmatmul.mubr.f32.gmra.mxu0 %v413_v35 }
  0x49   : > { %939 = vmatprep.mubr.f32.mxu0 %v414_v36 }
  0x4c   : > { %940 = vmatmul.mubr.f32.gmra.mxu0 %v415_v37 }
  0x92   : > { %v581_v41 = vpop.permute.xlu0 %580 }
  0x93   : > { %v571_v43 = vpop.permute.xlu1 %570 }
  0x96   : > { %v576_v47 = vpop.permute.xlu0 %575 }
  0x97   : > { %v566_v53 = vpop.permute.xlu1 %565 }
  0x9a   : > { %v602_v29 = vpop.permute.xlu0 %601 }
  0x9b   : > { %v607_v30 = vpop.permute.xlu1 %606 }
  0x9e   : > { %v612_v36 = vpop.permute.xlu0 %611 }
  0x9f   : > { %v617_v38 = vpop.permute.xlu1 %616 }
  0xfc   : > { %v929_v39 = vpop.f32.mrf.mxu0 }
  0xfd   : > { %v537_v49 = vmul.f32 %v929_v39, %v929_v39 }
  0xfe   : > { %v482_v40 = vpop.f32.mrf.mxu0 }
  0xff   : > { %v538_v59 = vrot.slane %v537_v49, 4  ;;  %v531_v4 = vrot.slane %v482_v40, 4 }
 0x100   : > { %v932_v42 = vpop.f32.mrf.mxu0 }
 0x101   : > { %v584_v50 = vadd.f32 %v932_v42, %v571_v43  ;;  %v539_v3 = vadd.f32 %v538_v59, %v537_v49  ;;  %v532_v11 = vadd.f32 %v531_v4, %v482_v40 }
 0x102   : > { %v492_v44 = vpop.f32.mrf.mxu0 }
 0x103   : > { %v583_v55 = vadd.f32 %v566_v53, %v492_v44  ;;  %v588_v60 = vmax.f32 %v584_v50, 0.0  ;;  %v540_v10 = vrot.slane %v539_v3, 2  ;;  %v533_v15 = vrot.slane %v532_v11, 2 }
 0x104   : > { %v935_v45 = vpop.f32.mrf.mxu0 }
 0x105   : > { %v586_v46 = vadd.f32 %v935_v45, %v581_v41  ;;  %v587_v63 = vmax.f32 %v583_v55, 0.0  ;;  %v541_v14 = vadd.f32 %v540_v10, %v539_v3  ;;  %v534_v19 = vadd.f32 %v533_v15, %v532_v11 }
 0x106   : > { %v502_v48 = vpop.f32.mrf.mxu0 }
 0x107   : > { %v590_v51 = vmax.f32 %v586_v46, 0.0  ;;  %v585_v52 = vadd.f32 %v576_v47, %v502_v48  ;;  %v542_v18 = vrot.slane %v541_v14, 1  ;;  %v535_v23 = vrot.slane %v534_v19, 1 }
 0x108   : > { %v938_v54 = vpop.f32.mrf.mxu0 }
 0x109   : > { %v589_v56 = vmax.f32 %v585_v52, 0.0  ;;  %v545_v57 = vmul.f32 %v938_v54, %v938_v54  ;;  %942 = vmatprep.subr.mxu1 %v590_v51  ;;  %v543_v22 = vadd.f32 %v542_v18, %v541_v14  ;;  %v536_v26 = vadd.f32 %v535_v23, %v534_v19 }
 0x10a   : > { %v512_v58 = vpop.f32.mrf.mxu0  ;;  %943 = vmatpush3.msra.mxu1 %v590_v51  ;;  %v733_v54 = vstv %s732_s21 }
 0x10b   : > { %v544_v61 = vmul.f32 %v512_v58, %v512_v58  ;;  %944 = vmatprep.subr.mxu1 %v589_v56 }
 0x10c   : > { %v941_v62 = vpop.f32.mrf.mxu0  ;;  %945 = vmatpush3.msra.mxu1 %v589_v56 }
 0x10d   : > { %v548_v0 = vadd.f32 %v545_v57, %v544_v61  ;;  %946 = vmatprep.subr.mxu1 %v588_v60  ;;  %v547_v5 = vmul.f32 %v941_v62, %v941_v62 }
 0x10e   : > { %v522_v1 = vpop.f32.mrf.mxu0  ;;  %947 = vmatpush3.msra.mxu1 %v588_v60 }
 0x10f   : > { %v546_v6 = vmul.f32 %v522_v1, %v522_v1  ;;  %948 = vmatprep.subr.mxu1 %v587_v63 }
 0x110   : > { %949 = vmatpush3.msra.mxu1 %v587_v63 }
 0x111   : > { %v549_v8 = vadd.f32 %v548_v0, %v546_v6  ;;  %951 = vmatmul.mubr.msk.f32.vlgmr.msra.gmra.mxu1 %vm619_vm0, %v592_v2 }
 0x112   : > { %953 = vmatprep.mubr.msk.f32.mxu1 %vm619_vm0, %v593_v7 }
 0x113   : > { %v550_v12 = vadd.f32 %v549_v8, %v547_v5 }
 0x115   : > { %v551_v13 = vrot.slane %v550_v12, 4  ;;  %954 = vmatmul.mubr.msk.f32.gmra.mxu1 %vm619_vm0, %v594_v9 }
 0x117   : > { %v552_v16 = vadd.f32 %v551_v13, %v550_v12 }
 0x119   : > { %v553_v17 = vrot.slane %v552_v16, 2 }
 0x11b   : > { %v554_v20 = vadd.f32 %v553_v17, %v552_v16 }
 0x11d   : > { %v555_v21 = vrot.slane %v554_v20, 1 }
 0x11f   : > { %v556_v24 = vadd.f32 %v555_v21, %v554_v20 }
 0x121   : > { %v557_v25 = vsub.f32 %v543_v22, %v556_v24 }
 0x123   : > { %v558_v27 = vmul.f32 0.5, %v557_v25 }
 0x125   : > { %v730_v28 = vadd.f32 %v558_v27, %v536_v26 }
 0x1d1   : > { %v952_v31 = vpop.f32.mrf.mxu1 }
 0x1d2   : > { %v704_v33 = vadd.f32 %v952_v31, %v607_v30 }
 0x1d3   : > { %v698_v32 = vpop.f32.mrf.mxu1 }
 0x1d4   : > { %v699_v34 = vadd.f32 %v698_v32, %v602_v29  ;;  %v718_v40 = vmax.f32 %v704_v33, 0.0 }
 0x1d5   : > { %v955_v35 = vpop.f32.mrf.mxu1 }
 0x1d6   : > { %v717_v37 = vmax.f32 %v699_v34, 0.0  ;;  %v714_v41 = vadd.f32 %v955_v35, %v617_v38 }
 0x1d7   : > { %v708_v39 = vpop.f32.mrf.mxu1 }
 0x1d8   : > { %v709_v42 = vadd.f32 %v708_v39, %v612_v36  ;;  %v721_v43 = vadd.f32 %v718_v40, %v717_v37  ;;  %v720_v45 = vmax.f32 %v714_v41, 0.0 }
 0x1da   : > { %v719_v44 = vmax.f32 %v709_v42, 0.0 }
 0x1dc   : > { %v722_v46 = vadd.f32 %v721_v43, %v719_v44 }
 0x1de   : > { %v723_v47 = vadd.f32 %v722_v46, %v720_v45 }
 0x1e0   : > { %v724_v48 = vrot.slane %v723_v47, 4 }
 0x1e2   : > { %v725_v49 = vadd.f32 %v724_v48, %v723_v47 }
 0x1e4   : > { %v726_v50 = vrot.slane %v725_v49, 2 }
 0x1e6   : > { %v727_v51 = vadd.f32 %v726_v50, %v725_v49 }
 0x1e8   : > { %v728_v52 = vrot.slane %v727_v51, 1 }
 0x1ea   : > { %v729_v53 = vadd.f32 %v728_v52, %v727_v51 }
 0x1ec   : > { %v731_v55 = vadd.f32 %v730_v28, %v729_v53 }
 0x1ee   : > { %v734_v56 = vadd.f32 %v733_v54, %v731_v55 }
 0x1f0   : > { %735 = vst [vmem:[%s282_s25] sm:$0x1] %v734_v56 }
 0x1f1   : > { %1011 = shalt.err (!%p1008_p3)
}
 0x1f2   : > { %s1012_s18 = scalar_lea.hbm %s747_s14, 16  ;;  %s1016_s21 = scalar_lea.hbm %s1313_s7, 32 }
 0x1f3   : > { %p1013_p4 = scmp.ne.s32.totalorder %s747_s14, %s1012_s18  ;;  %p1017_p9 = scmp.lt.s32.totalorder %s747_s14, %s1313_s7 }
 0x1f4   : > { %p1018_p10 = scmp.lt.s32.totalorder %s1016_s21, %s1012_s18 }
 0x1f5   : > { %p1014_p7 = pnand %p1013_p4, %p1143_p5 }
 0x1f6   : > { %p1019_p11 = por %p1018_p10, %p1017_p9 }
 0x1f7   : > { %p1015_p8 = pneg %p1014_p7 }
 0x1f9   : > { %p1020_p12 = pnand %p1019_p11, %p1015_p8 }
 0x1fb   : > { %1023 = shalt.err (!%p1020_p12)
}
 0x1fc   : > { %956 = dma.vmem_to_hbm [thread:$0]  (%p1143_p5), %s750_s30, 16, %s747_s14, %s737_s9  }
 0x1fd PF: > { %p962_p13 = scmp.ge.s32.totalorder %s1058_s29, 2  ;;  %s761_s25 = sand.u32 1, %s1046_s26  }
 0x1fe   : > { %s762_s10 = scalar_lea.sflag [#allocation4], %s761_s25 }
 0x1ff   : > { %p959_p0 = pnand %p962_p13, %p1147_p6 }
 0x201   : > { %p960_p1 = pneg %p959_p0 }
 0x203   : > { %1041 = dma.done.wait (%p960_p1), %s762_s10, 16  }
 0x204   : > { %1043 = vsyncadd (%p960_p1), %s762_s10, 4294967280  ;;  %p18_p2 = scmp.ge.s32.totalorder %s1130_s8, 4   ;;  %s1316_s26 = smov %s1050_s27 }
 0x205   : > { %s1317_s27 = smov %s1054_s28  ;;  %s1318_s28 = smov %s1141_s11 }
 0x206   : > { %s1319_s29 = smov %s1130_s8  ;;  %20 = sbr.rel (!%p18_p2) target bundleno = 5 (0x5), region = 86 }
 0x20b   :  { %766 = vsyncpa [#allocation4], 1 }
 0x20c   :  { %768 = vsyncpa [#allocation4 + $0x1], 1 }

</bundles_post_ra>
